<compile_context>
chip_gen: v7x
topology: tpu7x:2x2x1
jax: 0.10.0
libtpu: 0.0.40
codegen_flags: <defaults>
</compile_context>

<pallas_src>
import functools

import jax
import jax.numpy as jnp
from jax.experimental import pallas as pl
from jax.experimental.pallas import tpu as pltpu


_VMEM_LIMIT = 48 * 1024 * 1024          # explicit scoped-VMEM limit (safe on v5e/v6e/v7x)
_FUSED_VMEM_BUDGET = 24 * 1024 * 1024   # pick the single fused kernel under this footprint
_RESIDENT_P1_BUDGET = 20 * 1024 * 1024  # keep prev1 whole in VMEM (x2 buffers) under this


def _round_up(v, m):
    return ((v + m - 1) // m) * m


def _pad_to(arr, shape, dtype):
    """Zero-pad/cast to `shape`/`dtype`, skipping the copy if it already matches
    (lets callers pre-pad adj once per graph instead of paying ~N^2 bytes per call)."""
    if arr.shape == tuple(shape) and arr.dtype == jnp.dtype(dtype):
        return arr
    out = jnp.zeros(shape, dtype)
    return out.at[tuple(slice(0, s) for s in arr.shape)].set(arr.astype(dtype))


# ----------------------------------------------------------------------------- fused path
def _cheb_fused_kernel(x_ref, adj_ref, w_ref, o_ref, prev_ref, *, k):
    """Whole Chebyshev recurrence in one kernel: adj/x/W resident in VMEM,
    xs[i-1]/xs[i-2] ping-pong in the (2, N, F) f32 scratch (slot = i & 1)."""
    w = w_ref[...]
    xw = jnp.dot(x_ref[...].astype(w.dtype), w, preferred_element_type=jnp.float32)
    if k <= 2:
        o_ref[...] = xw.astype(o_ref.dtype)
        return

    adj = adj_ref[...]
    prev_ref[0] = xw          # xs[0]
    prev_ref[1] = xw          # xs[1]  (identical to xs[0] by construction)
    for i in range(2, k):     # k is a static Python int -> unrolled, static slot indices
        s_new = i & 1         # xs[i] overwrites xs[i-2]
        s_p1 = (i - 1) & 1
        p1 = prev_ref[s_p1]
        p2 = prev_ref[s_new]
        # Scale the (N, F) accumulator, never the (N, N) adjacency.
        support = 2.0 * jnp.dot(adj, p1.astype(adj.dtype),
                                preferred_element_type=jnp.float32) - p2
        prev_ref[s_new] = jnp.dot(support.astype(w.dtype), w,
                                  preferred_element_type=jnp.float32)
    o_ref[...] = prev_ref[(k - 1) & 1].astype(o_ref.dtype)


# ----------------------------------------------------------------------------- tiled path
def _xw_kernel(x_ref, w_ref, o_ref):
    # out = x @ W  (covers Chebyshev orders 0 and 1, which are identical).
    o_ref[...] = jnp.dot(x_ref[...], w_ref[...],
                         preferred_element_type=jnp.float32).astype(o_ref.dtype)


def _cheb_step_kernel_resident(adj_ref, p1_ref, p2_ref, w_ref, o_ref, acc_ref, *, tk):
    """One Chebyshev step for a (tm, F) row block; prev1 is the FULL (N, F) array
    resident in VMEM (constant index_map), sliced per reduction block in-kernel."""
    kk = pl.program_id(1)

    @pl.when(kk == 0)
    def _init():
        acc_ref[...] = jnp.zeros_like(acc_ref)

    start = pl.multiple_of(kk * tk, tk)
    p1_blk = p1_ref[pl.ds(start, tk), :]
    acc_ref[...] += jnp.dot(adj_ref[...], p1_blk.astype(adj_ref.dtype),
                            preferred_element_type=jnp.float32)

    @pl.when(kk == pl.num_programs(1) - 1)
    def _finalize():
        support = 2.0 * acc_ref[...] - p2_ref[...].astype(jnp.float32)
        o_ref[...] = jnp.dot(support.astype(w_ref.dtype), w_ref[...],
                             preferred_element_type=jnp.float32).astype(o_ref.dtype)


def _cheb_step_kernel_blocked(adj_ref, p1_ref, p2_ref, w_ref, o_ref, acc_ref):
    """Fallback when prev1 is too large to keep resident: prev1 streamed per block."""
    kk = pl.program_id(1)

    @pl.when(kk == 0)
    def _init():
        acc_ref[...] = jnp.zeros_like(acc_ref)

    acc_ref[...] += jnp.dot(adj_ref[...], p1_ref[...].astype(adj_ref.dtype),
                            preferred_element_type=jnp.float32)

    @pl.when(kk == pl.num_programs(1) - 1)
    def _finalize():
        support = 2.0 * acc_ref[...] - p2_ref[...].astype(jnp.float32)
        o_ref[...] = jnp.dot(support.astype(w_ref.dtype), w_ref[...],
                             preferred_element_type=jnp.float32).astype(o_ref.dtype)


# ----------------------------------------------------------------------------- wrapper
def cheb_convolution(x, adj, w, k, *, adj_dtype=None, force_tiled=False):
    """Pallas forward pass of ChebConvolution.

    adj_dtype: optional floating dtype (e.g. jnp.bfloat16) for adj and the Chebyshev
    intermediates; halves HBM traffic on the adj-bandwidth-bound steps (loosen output
    tolerances accordingly). Default keeps everything in f32.
    force_tiled: force the streaming/tiled path (mainly for testing large-graph code).
    """
    n, in_dim = x.shape
    in_dim_w, out_dim = w.shape
    if in_dim_w != in_dim:
        raise ValueError("W first dim must equal x feature dim")
    if adj.shape != (n, n):
        raise ValueError("adj must be (N, N)")
    if k < 1:
        raise ValueError("k must be >= 1")
    if k >= 3 and in_dim != out_dim:
        raise ValueError(
            "ChebConvolution with k >= 3 requires in_dim == out_dim "
            "(support @ W shape constraint in the original module).")
    if adj_dtype is not None and not jnp.issubdtype(jnp.dtype(adj_dtype), jnp.floating):
        raise ValueError(f"adj_dtype must be a floating dtype, got {adj_dtype!r}")

    compute_dtype = jnp.float32 if adj_dtype is None else jnp.dtype(adj_dtype)
    itemsize = jnp.dtype(compute_dtype).itemsize

    # Lane-dense feature dims (multiples of 128) -> full-width, unmasked vector stores.
    fin = _round_up(in_dim, 128)
    fout = _round_up(out_dim, 128)

    # ---------------- fused single-kernel path (adj fits VMEM) ----------------
    n128 = _round_up(n, 128)
    fused_bytes = (2 * n128 * n128 * itemsize      # adj (double-buffered)
                   + 2 * n128 * fin * itemsize     # x
                   + 2 * fin * fout * itemsize     # W
                   + 2 * n128 * fout * 4           # out (f32)
                   + 2 * n128 * fout * 4)          # prev ping-pong scratch (f32)
    use_fused = (not force_tiled) and fused_bytes <= _FUSED_VMEM_BUDGET

    if use_fused:
        n_pad = n128
        x_p = _pad_to(x, (n_pad, fin), compute_dtype)
        w_p = _pad_to(w, (fin, fout), compute_dtype)
        adj_p = _pad_to(adj, (n_pad, n_pad), compute_dtype)

        flops = 2 * n_pad * fin * fout + max(k - 2, 0) * (
            2 * n_pad * n_pad * fout + 2 * n_pad * fin * fout)
        out = pl.pallas_call(
            functools.partial(_cheb_fused_kernel, k=k),
            out_shape=jax.ShapeDtypeStruct((n_pad, fout), jnp.float32),
            grid_spec=pltpu.PrefetchScalarGridSpec(
                num_scalar_prefetch=0,
                grid=(1,),
                in_specs=[
                    pl.BlockSpec((n_pad, fin), lambda i: (0, 0)),
                    pl.BlockSpec((n_pad, n_pad), lambda i: (0, 0)),
                    pl.BlockSpec((fin, fout), lambda i: (0, 0)),
                ],
                out_specs=pl.BlockSpec((n_pad, fout), lambda i: (0, 0)),
                scratch_shapes=[pltpu.VMEM((2, n_pad, fout), jnp.float32)],
            ),
            compiler_params=pltpu.CompilerParams(
                dimension_semantics=("arbitrary",),
                vmem_limit_bytes=_VMEM_LIMIT),
            cost_estimate=pl.CostEstimate(
                flops=flops, transcendentals=0,
                bytes_accessed=(n_pad * n_pad + n_pad * fin + fin * fout) * itemsize
                               + n_pad * fout * 4),
        )(x_p, adj_p, w_p)
        return out[:n, :out_dim].astype(x.dtype)

    # ---------------- tiled / streaming path (adj does not fit VMEM) ----------
    # Large tiles (512) for HBM-roofline efficiency; keep >= 2 row blocks so the
    # "parallel" row axis can be sharded across v7x's two TensorCores.
    tile = 512 if n > 1024 else 256 if n > 256 else 128
    n_pad = _round_up(n, tile)
    while tile > 128 and n_pad // tile < 2:
        tile //= 2
        n_pad = _round_up(n, tile)
    tm = tk = tile

    x_p = _pad_to(x, (n_pad, fin), compute_dtype)
    w_p = _pad_to(w, (fin, fout), compute_dtype)
    adj_p = _pad_to(adj, (n_pad, n_pad), compute_dtype)

    # orders 0 and 1: xw = x @ W (computed once; they are identical).
    xw = pl.pallas_call(
        _xw_kernel,
        out_shape=jax.ShapeDtypeStruct((n_pad, fout), compute_dtype),
        grid_spec=pltpu.PrefetchScalarGridSpec(
            num_scalar_prefetch=0,
            grid=(n_pad // tm,),
            in_specs=[pl.BlockSpec((tm, fin), lambda i: (i, 0)),
                      pl.BlockSpec((fin, fout), lambda i: (0, 0))],
            out_specs=pl.BlockSpec((tm, fout), lambda i: (i, 0)),
        ),
        compiler_params=pltpu.CompilerParams(
            dimension_semantics=("parallel",),
            vmem_limit_bytes=_VMEM_LIMIT),
    )(x_p, w_p)

    if k <= 2:
        out = xw
    else:
        resident = 2 * n_pad * fout * itemsize <= _RESIDENT_P1_BUDGET
        if resident:
            kernel = functools.partial(_cheb_step_kernel_resident, tk=tk)
            p1_spec = pl.BlockSpec((n_pad, fout), lambda i, kk: (0, 0))   # whole array, DMA'd once
        else:
            kernel = _cheb_step_kernel_blocked
            p1_spec = pl.BlockSpec((tk, fout), lambda i, kk: (kk, 0))

        cost = pl.CostEstimate(
            flops=2 * n_pad * n_pad * fout + 2 * n_pad * fin * fout,
            transcendentals=0,
            bytes_accessed=(n_pad * n_pad + 3 * n_pad * fout + fin * fout) * itemsize)

        step = pl.pallas_call(
            kernel,
            out_shape=jax.ShapeDtypeStruct((n_pad, fout), compute_dtype),
            grid_spec=pltpu.PrefetchScalarGridSpec(
                num_scalar_prefetch=0,
                grid=(n_pad // tm, n_pad // tk),
                in_specs=[
                    pl.BlockSpec((tm, tk), lambda i, kk: (i, kk)),      # adj tile
                    p1_spec,                                             # prev1
                    pl.BlockSpec((tm, fout), lambda i, kk: (i, 0)),      # prev2 rows
                    pl.BlockSpec((fin, fout), lambda i, kk: (0, 0)),     # W
                ],
                out_specs=pl.BlockSpec((tm, fout), lambda i, kk: (i, 0)),
                scratch_shapes=[pltpu.VMEM((tm, fout), jnp.float32)],
            ),
            compiler_params=pltpu.CompilerParams(
                dimension_semantics=("parallel", "arbitrary"),
                vmem_limit_bytes=_VMEM_LIMIT),
            cost_estimate=cost,
        )

        # xs[0] == xs[1] == x @ W  -> seed the recurrence without recomputing.
        prev2, prev1 = xw, xw
        for _ in range(2, k):
            new = step(adj_p, prev1, prev2, w_p)
            prev2, prev1 = prev1, new
        out = prev1

    return out[:n, :out_dim].astype(x.dtype)


def cheb_convolution_ref(x, adj, w, k):
    """Pure-JAX reference mirroring the PyTorch forward exactly."""
    xs = []
    for i in range(k):
        if i == 0:
            xs.append(x @ w)
        elif i == 1:
            _ = adj @ x  # dead value in the original code
            xs.append(x @ w)
        else:
            support = (2.0 * adj) @ xs[i - 1] - xs[i - 2]
            xs.append(support @ w)
    return xs[-1]


if __name__ == "__main__":
    key = jax.random.PRNGKey(0)

    # --- small graph: fully fused single-kernel path ---------------------------
    N, IN_DIM, OUT_DIM, K = 64, 32, 32, 4
    kx, kadj, kw, key2 = jax.random.split(key, 4)

    x = jax.random.normal(kx, (N, IN_DIM), dtype=jnp.float32)
    a = jax.random.normal(kadj, (N, N), dtype=jnp.float32)
    adj = (a + a.T) / (2.0 * jnp.sqrt(jnp.float32(N)))          # symmetric Laplacian-like
    bound = (6.0 / (IN_DIM + OUT_DIM)) ** 0.5                   # xavier_uniform_
    W = jax.random.uniform(kw, (IN_DIM, OUT_DIM), dtype=jnp.float32,
                           minval=-bound, maxval=bound)

    out = jax.block_until_ready(cheb_convolution(x, adj, W, K))
    ref = cheb_convolution_ref(x, adj, W, K)
    if not jnp.allclose(out, ref, atol=2e-3, rtol=2e-3):
        raise AssertionError("fused-path output mismatch vs reference")

    # --- medium graph: tiled/streaming path (resident prev1) -------------------
    N2, F2, K2 = 640, 128, 3
    ka, kb, kc = jax.random.split(key2, 3)
    x2 = jax.random.normal(ka, (N2, F2), dtype=jnp.float32)
    a2 = jax.random.normal(kb, (N2, N2), dtype=jnp.float32)
    adj2 = (a2 + a2.T) / (2.0 * jnp.sqrt(jnp.float32(N2)))
    bound2 = (6.0 / (F2 + F2)) ** 0.5
    W2 = jax.random.uniform(kc, (F2, F2), dtype=jnp.float32,
                            minval=-bound2, maxval=bound2)

    out2 = jax.block_until_ready(cheb_convolution(x2, adj2, W2, K2, force_tiled=True))
    ref2 = cheb_convolution_ref(x2, adj2, W2, K2)
    if not jnp.allclose(out2, ref2, atol=2e-2, rtol=2e-2):
        raise AssertionError("tiled-path output mismatch vs reference")

    print("KERNEL_OK")
</pallas_src>

<mosaic_0001>
module attributes {stable_mosaic.version = 11 : i64} {
  func.func @_cheb_fused_kernel(%arg0: i32, %arg1: memref<128x128xf32, #tpu.memory_space<vmem>>, %arg2: memref<128x128xf32, #tpu.memory_space<vmem>>, %arg3: memref<128x128xf32, #tpu.memory_space<vmem>>, %arg4: memref<128x128xf32, #tpu.memory_space<vmem>>, %arg5: memref<2x128x128xf32, #tpu.memory_space<vmem>>) attributes {dimension_semantics = [#tpu.dimension_semantics<arbitrary>], iteration_bounds = array<i64: 1>, scalar_prefetch = 0 : i64, scratch_operands = 1 : i64, tpu.core_type = #tpu.core_type<tc>, window_params = [{pipeline_mode = #tpu.pipeline_mode<synchronous>, transform_indices = @transform_0, window_bounds = array<i64: 128, 128>}, {pipeline_mode = #tpu.pipeline_mode<synchronous>, transform_indices = @transform_1, window_bounds = array<i64: 128, 128>}, {pipeline_mode = #tpu.pipeline_mode<synchronous>, transform_indices = @transform_2, window_bounds = array<i64: 128, 128>}, {pipeline_mode = #tpu.pipeline_mode<synchronous>, transform_indices = @transform_3, window_bounds = array<i64: 128, 128>}]} {
    %c0 = arith.constant 0 : index
    %c0_0 = arith.constant 0 : index
    %0 = vector.load %arg3[%c0, %c0_0] : memref<128x128xf32, #tpu.memory_space<vmem>>, vector<128x128xf32>
    %c0_1 = arith.constant 0 : index
    %c0_2 = arith.constant 0 : index
    %1 = vector.load %arg1[%c0_1, %c0_2] : memref<128x128xf32, #tpu.memory_space<vmem>>, vector<128x128xf32>
    %cst = arith.constant dense<0.000000e+00> : vector<128x128xf32>
    %2 = tpu.matmul %1, %0, %cst {dimension_numbers = #tpu.dot_dimension_numbers<[1], [0], [0], [1], [0, 0, 1, 1], [], []>} : vector<128x128xf32>, vector<128x128xf32>, vector<128x128xf32> -> vector<128x128xf32>
    %c0_3 = arith.constant 0 : index
    %c0_4 = arith.constant 0 : index
    %3 = vector.load %arg2[%c0_3, %c0_4] : memref<128x128xf32, #tpu.memory_space<vmem>>, vector<128x128xf32>
    %c0_5 = arith.constant 0 : index
    %c0_6 = arith.constant 0 : index
    %c0_7 = arith.constant 0 : index
    %4 = vector.load %arg5[%c0_5, %c0_6, %c0_7] : memref<2x128x128xf32, #tpu.memory_space<vmem>>, vector<1x128x128xf32>
    %5 = vector.shape_cast %4 : vector<1x128x128xf32> to vector<128x128xf32>
    %6 = vector.shape_cast %2 : vector<128x128xf32> to vector<1x128x128xf32>
    tpu.vector_store %arg5[%c0_5, %c0_6, %c0_7], %6 {strides = array<i32>} : memref<2x128x128xf32, #tpu.memory_space<vmem>>, vector<1x128x128xf32>,
    %c1 = arith.constant 1 : index
    %c0_8 = arith.constant 0 : index
    %c0_9 = arith.constant 0 : index
    %7 = vector.load %arg5[%c1, %c0_8, %c0_9] : memref<2x128x128xf32, #tpu.memory_space<vmem>>, vector<1x128x128xf32>
    %8 = vector.shape_cast %7 : vector<1x128x128xf32> to vector<128x128xf32>
    %9 = vector.shape_cast %2 : vector<128x128xf32> to vector<1x128x128xf32>
    tpu.vector_store %arg5[%c1, %c0_8, %c0_9], %9 {strides = array<i32>} : memref<2x128x128xf32, #tpu.memory_space<vmem>>, vector<1x128x128xf32>,
    %c1_10 = arith.constant 1 : index
    %c0_11 = arith.constant 0 : index
    %c0_12 = arith.constant 0 : index
    %10 = vector.load %arg5[%c1_10, %c0_11, %c0_12] : memref<2x128x128xf32, #tpu.memory_space<vmem>>, vector<1x128x128xf32>
    %11 = vector.shape_cast %10 : vector<1x128x128xf32> to vector<128x128xf32>
    %c0_13 = arith.constant 0 : index
    %c0_14 = arith.constant 0 : index
    %c0_15 = arith.constant 0 : index
    %12 = vector.load %arg5[%c0_13, %c0_14, %c0_15] : memref<2x128x128xf32, #tpu.memory_space<vmem>>, vector<1x128x128xf32>
    %13 = vector.shape_cast %12 : vector<1x128x128xf32> to vector<128x128xf32>
    %cst_16 = arith.constant dense<0.000000e+00> : vector<128x128xf32>
    %14 = tpu.matmul %3, %11, %cst_16 {dimension_numbers = #tpu.dot_dimension_numbers<[1], [0], [0], [1], [0, 0, 1, 1], [], []>} : vector<128x128xf32>, vector<128x128xf32>, vector<128x128xf32> -> vector<128x128xf32>
    %cst_17 = arith.constant 2.000000e+00 : f32
    %15 = vector.broadcast %cst_17 : f32 to vector<128x128xf32>
    %16 = arith.mulf %15, %14 : vector<128x128xf32>
    %17 = arith.subf %16, %13 : vector<128x128xf32>
    %cst_18 = arith.constant dense<0.000000e+00> : vector<128x128xf32>
    %18 = tpu.matmul %17, %0, %cst_18 {dimension_numbers = #tpu.dot_dimension_numbers<[1], [0], [0], [1], [0, 0, 1, 1], [], []>} : vector<128x128xf32>, vector<128x128xf32>, vector<128x128xf32> -> vector<128x128xf32>
    %c0_19 = arith.constant 0 : index
    %c0_20 = arith.constant 0 : index
    %c0_21 = arith.constant 0 : index
    %19 = vector.load %arg5[%c0_19, %c0_20, %c0_21] : memref<2x128x128xf32, #tpu.memory_space<vmem>>, vector<1x128x128xf32>
    %20 = vector.shape_cast %19 : vector<1x128x128xf32> to vector<128x128xf32>
    %21 = vector.shape_cast %18 : vector<128x128xf32> to vector<1x128x128xf32>
    tpu.vector_store %arg5[%c0_19, %c0_20, %c0_21], %21 {strides = array<i32>} : memref<2x128x128xf32, #tpu.memory_space<vmem>>, vector<1x128x128xf32>,
    %c0_22 = arith.constant 0 : index
    %c0_23 = arith.constant 0 : index
    %c0_24 = arith.constant 0 : index
    %22 = vector.load %arg5[%c0_22, %c0_23, %c0_24] : memref<2x128x128xf32, #tpu.memory_space<vmem>>, vector<1x128x128xf32>
    %23 = vector.shape_cast %22 : vector<1x128x128xf32> to vector<128x128xf32>
    %c1_25 = arith.constant 1 : index
    %c0_26 = arith.constant 0 : index
    %c0_27 = arith.constant 0 : index
    %24 = vector.load %arg5[%c1_25, %c0_26, %c0_27] : memref<2x128x128xf32, #tpu.memory_space<vmem>>, vector<1x128x128xf32>
    %25 = vector.shape_cast %24 : vector<1x128x128xf32> to vector<128x128xf32>
    %cst_28 = arith.constant dense<0.000000e+00> : vector<128x128xf32>
    %26 = tpu.matmul %3, %23, %cst_28 {dimension_numbers = #tpu.dot_dimension_numbers<[1], [0], [0], [1], [0, 0, 1, 1], [], []>} : vector<128x128xf32>, vector<128x128xf32>, vector<128x128xf32> -> vector<128x128xf32>
    %cst_29 = arith.constant 2.000000e+00 : f32
    %27 = vector.broadcast %cst_29 : f32 to vector<128x128xf32>
    %28 = arith.mulf %27, %26 : vector<128x128xf32>
    %29 = arith.subf %28, %25 : vector<128x128xf32>
    %cst_30 = arith.constant dense<0.000000e+00> : vector<128x128xf32>
    %30 = tpu.matmul %29, %0, %cst_30 {dimension_numbers = #tpu.dot_dimension_numbers<[1], [0], [0], [1], [0, 0, 1, 1], [], []>} : vector<128x128xf32>, vector<128x128xf32>, vector<128x128xf32> -> vector<128x128xf32>
    %c1_31 = arith.constant 1 : index
    %c0_32 = arith.constant 0 : index
    %c0_33 = arith.constant 0 : index
    %31 = vector.load %arg5[%c1_31, %c0_32, %c0_33] : memref<2x128x128xf32, #tpu.memory_space<vmem>>, vector<1x128x128xf32>
    %32 = vector.shape_cast %31 : vector<1x128x128xf32> to vector<128x128xf32>
    %33 = vector.shape_cast %30 : vector<128x128xf32> to vector<1x128x128xf32>
    tpu.vector_store %arg5[%c1_31, %c0_32, %c0_33], %33 {strides = array<i32>} : memref<2x128x128xf32, #tpu.memory_space<vmem>>, vector<1x128x128xf32>,
    %c1_34 = arith.constant 1 : index
    %c0_35 = arith.constant 0 : index
    %c0_36 = arith.constant 0 : index
    %34 = vector.load %arg5[%c1_34, %c0_35, %c0_36] : memref<2x128x128xf32, #tpu.memory_space<vmem>>, vector<1x128x128xf32>
    %35 = vector.shape_cast %34 : vector<1x128x128xf32> to vector<128x128xf32>
    %c0_37 = arith.constant 0 : index
    %c0_38 = arith.constant 0 : index
    %36 = vector.load %arg4[%c0_37, %c0_38] : memref<128x128xf32, #tpu.memory_space<vmem>>, vector<128x128xf32>
    tpu.vector_store %arg4[%c0_37, %c0_38], %35 {strides = array<i32>} : memref<128x128xf32, #tpu.memory_space<vmem>>, vector<128x128xf32>,
    return
  }
  func.func @transform_0(%arg0: i32) -> (i32, i32) {
    %c0_i32 = arith.constant 0 : i32
    %c0_i32_0 = arith.constant 0 : i32
    %c0_i32_1 = arith.constant 0 : i32
    return %c0_i32, %c0_i32_0 : i32, i32
  }
  func.func @transform_1(%arg0: i32) -> (i32, i32) {
    %c0_i32 = arith.constant 0 : i32
    %c0_i32_0 = arith.constant 0 : i32
    %c0_i32_1 = arith.constant 0 : i32
    return %c0_i32, %c0_i32_0 : i32, i32
  }
  func.func @transform_2(%arg0: i32) -> (i32, i32) {
    %c0_i32 = arith.constant 0 : i32
    %c0_i32_0 = arith.constant 0 : i32
    %c0_i32_1 = arith.constant 0 : i32
    return %c0_i32, %c0_i32_0 : i32, i32
  }
  func.func @transform_3(%arg0: i32) -> (i32, i32) {
    %c0_i32 = arith.constant 0 : i32
    %c0_i32_0 = arith.constant 0 : i32
    %c0_i32_1 = arith.constant 0 : i32
    return %c0_i32, %c0_i32_0 : i32, i32
  }
}

</mosaic_0001>

<bundles_post_ra>
// kernel: tpu_custom_call.1
= control target key start
LH: loop header
LB: loop body
LE: loop exit
PB: predicated region body
PF: predicated region fallthrough
CT: control target
= control target key end

     0   :  { %8 = vsyncpa [#allocation4], 0  ;;  %s2105_s0 = inlined_call_operand.hbm [shape: f32[128,128], index: 0, kind: input, shape index: {}]   ;;  %s2106_s1 = inlined_call_operand.hbm [shape: f32[128,128], index: 1, kind: input, shape index: {}]   ;;  %s2107_s2 = inlined_call_operand.hbm [shape: f32[128,128], index: 2, kind: input, shape index: {}]   ;;  %s2108_s3 = inlined_call_operand.hbm [shape: f32[128,128], index: 3, kind: output, shape index: {}]  }
   0x1   :  { %9 = vsyncpa [#allocation7], 0 }
   0x2   :  { %10 = vsyncpa [#allocation5], 0  ;;  %s1788_s12 = smov [#allocation6]   ;;  %s1789_s14 = smov [#allocation3]  }
   0x3   :  { %s28_s13 = sshll.u32 %s1788_s12, 4  ;;  %s16_s15 = sshll.u32 %s1789_s14, 4  ;;  %s29_s13 = int_to_ptr.vmem [resolvable:$true] %s28_s13  ;;  %s1814_s15 = int_to_ptr.vmem [resolvable:$true] %s16_s15 }
   0x4   :  { %s1694_s18 = scalar_lea.hbm %s2106_s1, 2048 }
   0x5   :  { %p1695_p0 = scmp.ne.s32.totalorder %s2106_s1, %s1694_s18  ;;  %p1698_p1 = scmp.lt.u32.totalorder %s1694_s18, %s2106_s1 }
   0x7   :  { %p1700_p2 = pnand %p1698_p1, %p1695_p0 }
   0x9   :  { %1703 = shalt.err (!%p1700_p2)
}
   0xa   :  { %s1704_s23 = scalar_lea.vmem %s29_s13, 2048  ;;  %p1709_p4 = scmp.lt.s32.totalorder %s29_s13, %s29_s13 }
   0xb   :  { %p1705_p3 = scmp.ne.s32.totalorder %s29_s13, %s1704_s23  ;;  %p1710_p5 = scmp.lt.s32.totalorder %s1704_s23, %s1704_s23 }
   0xd   :  { %p1711_p6 = por %p1710_p5, %p1709_p4 }
   0xf   :  { %p1712_p7 = pnand %p1711_p6, %p1705_p3 }
  0x11   :  { %1715 = shalt.err (!%p1712_p7)
}
  0x12   :  { %s1790_s24 = smov 128   ;;  %s1791_s25 = smov 8  }
  0x13   :  { %34 = dma.hbm_to_vmem [thread:$0]  %s2106_s1, 2048, %s29_s13, [#allocation7], %s1790_s24, %s1790_s24, %s1791_s25  }
  0x14   :  { %s1716_s30 = scalar_lea.hbm %s2105_s0, 2048 }
  0x15   :  { %p1717_p8 = scmp.ne.s32.totalorder %s2105_s0, %s1716_s30  ;;  %p1720_p9 = scmp.lt.u32.totalorder %s1716_s30, %s2105_s0 }
  0x17   :  { %p1722_p10 = pnand %p1720_p9, %p1717_p8 }
  0x19   :  { %1725 = shalt.err (!%p1722_p10)
}
  0x1a   :  { %s1726_s8 = scalar_lea.vmem %s1814_s15, 2048  ;;  %p1731_p12 = scmp.lt.s32.totalorder %s1814_s15, %s1814_s15 }
  0x1b   :  { %p1727_p11 = scmp.ne.s32.totalorder %s1814_s15, %s1726_s8  ;;  %p1732_p13 = scmp.lt.s32.totalorder %s1726_s8, %s1726_s8 }
  0x1d   :  { %p1733_p0 = por %p1732_p13, %p1731_p12 }
  0x1f   :  { %p1734_p1 = pnand %p1733_p0, %p1727_p11 }
  0x21   :  { %1737 = shalt.err (!%p1734_p1)
}
  0x22   :  { %22 = dma.hbm_to_vmem [thread:$0]  %s2105_s0, 2048, %s1814_s15, [#allocation4], %s1790_s24, %s1790_s24, %s1791_s25  }
  0x23   :  { %s1792_s10 = smov [#allocation8]   ;;  %s1738_s14 = scalar_lea.hbm %s2107_s2, 2048 }
  0x24   :  { %s40_s11 = sshll.u32 %s1792_s10, 4  ;;  %p1739_p2 = scmp.ne.s32.totalorder %s2107_s2, %s1738_s14  ;;  %s41_s11 = int_to_ptr.vmem [resolvable:$true] %s40_s11 }
  0x25   :  { %p1742_p3 = scmp.lt.u32.totalorder %s1738_s14, %s2107_s2 }
  0x27   :  { %p1744_p4 = pnand %p1742_p3, %p1739_p2 }
  0x29   :  { %1747 = shalt.err (!%p1744_p4)
}
  0x2a   :  { %s1748_s20 = scalar_lea.vmem %s41_s11, 2048  ;;  %p1753_p6 = scmp.lt.s32.totalorder %s41_s11, %s41_s11 }
  0x2b   :  { %p1749_p5 = scmp.ne.s32.totalorder %s41_s11, %s1748_s20  ;;  %p1754_p7 = scmp.lt.s32.totalorder %s1748_s20, %s1748_s20 }
  0x2d   :  { %p1755_p8 = por %p1754_p7, %p1753_p6 }
  0x2f   :  { %p1756_p9 = pnand %p1755_p8, %p1749_p5 }
  0x31   :  { %1759 = shalt.err (!%p1756_p9)
}
  0x32   :  { %46 = dma.hbm_to_vmem [thread:$0]  %s2107_s2, 2048, %s41_s11, [#allocation7], %s1790_s24, %s1790_s24, %s1791_s25  }
  0x33   :  { %1782 = dma.done.wait [#allocation4], 2048  }
  0x34   :  { %1783 = vsyncadd [#allocation4], 4294965248 }
  0x35   :  { %1784 = dma.done.wait [#allocation7], 4096  }
  0x36   :  { %1785 = vsyncadd [#allocation7], 4294963200  ;;  %v56_v0 = vld [vmem:[#allocation8] sm:$0xff]  ;;  %v57_v1 = vld [vmem:[#allocation8 + $0x8] sm:$0xff]  ;;  %s1793_s2 = smov [#allocation9]  }
  0x37   :  { %v58_v2 = vld [vmem:[#allocation8 + $0x10] sm:$0xff]  ;;  %v1866_v3 = vpack.c.bf16 %v57_v1, %v56_v0  ;;  %v59_v4 = vld [vmem:[#allocation8 + $0x18] sm:$0xff]  ;;  %v60_v6 = vld [vmem:[#allocation8 + $0x20] sm:$0xff]  ;;  %s1059_s21 = sshll.u32 %s1793_s2, 4  ;;  %s1060_s21 = int_to_ptr.vmem [resolvable:$true] %s1059_s21 }
  0x38   :  { %v1868_v5 = vpack.c.bf16 %v59_v4, %v58_v2  ;;  %v61_v7 = vld [vmem:[#allocation8 + $0x28] sm:$0xff]  ;;  %v72_v9 = vld [vmem:[#allocation3] sm:$0xff]  ;;  %v62_v10 = vld [vmem:[#allocation8 + $0x30] sm:$0xff]  ;;  %s1760_s22 = scalar_lea.vmem %s1060_s21, 2048  ;;  %p1765_p11 = scmp.lt.s32.totalorder %s1060_s21, %s1060_s21 }
  0x39   :  { %1513 = vmatprep.subr.bf16.mxu0 %v1866_v3  ;;  %v1873_v8 = vpack.c.bf16 %v61_v7, %v60_v6  ;;  %v63_v11 = vld [vmem:[#allocation8 + $0x38] sm:$0xff]  ;;  %1264 = vmatprep.mubr.f32.mxu0 %v72_v9  ;;  %v64_v13 = vld [vmem:[#allocation8 + $0x40] sm:$0xff]  ;;  %v65_v14 = vld [vmem:[#allocation8 + $0x48] sm:$0xff]  ;;  %p1761_p10 = scmp.ne.s32.totalorder %s1060_s21, %s1760_s22  ;;  %p1766_p12 = scmp.lt.s32.totalorder %s1760_s22, %s1760_s22 }
  0x3a   :  { %1515 = vmatpush3.bf16.msra.mxu0 %v1866_v3  ;;  %v1877_v12 = vpack.c.bf16 %v63_v11, %v62_v10  ;;  %v1881_v15 = vpack.c.bf16 %v65_v14, %v64_v13  ;;  %v66_v16 = vld [vmem:[#allocation8 + $0x50] sm:$0xff]  ;;  %v67_v17 = vld [vmem:[#allocation8 + $0x58] sm:$0xff]  ;;  %v68_v19 = vld [vmem:[#allocation8 + $0x60] sm:$0xff] }
  0x3b   :  { %1517 = vmatprep.subr.bf16.mxu0 %v1868_v5  ;;  %v1885_v18 = vpack.c.bf16 %v67_v17, %v66_v16  ;;  %v69_v20 = vld [vmem:[#allocation8 + $0x68] sm:$0xff]  ;;  %v70_v22 = vld [vmem:[#allocation8 + $0x70] sm:$0xff]  ;;  %v71_v23 = vld [vmem:[#allocation8 + $0x78] sm:$0xff]  ;;  %p1767_p13 = por %p1766_p12, %p1765_p11 }
  0x3c   :  { %v1889_v21 = vpack.c.bf16 %v69_v20, %v68_v19  ;;  %v1893_v24 = vpack.c.bf16 %v71_v23, %v70_v22  ;;  %v73_v25 = vld [vmem:[#allocation3 + $0x8] sm:$0xff]  ;;  %v74_v26 = vld [vmem:[#allocation3 + $0x10] sm:$0xff]  ;;  %v75_v27 = vld [vmem:[#allocation3 + $0x18] sm:$0xff] }
  0x3d   :  { %v76_v28 = vld [vmem:[#allocation3 + $0x20] sm:$0xff]  ;;  %v77_v29 = vld [vmem:[#allocation3 + $0x28] sm:$0xff]  ;;  %v78_v30 = vld [vmem:[#allocation3 + $0x30] sm:$0xff]  ;;  %p1768_p0 = pnand %p1767_p13, %p1761_p10 }
  0x3e   :  { %1519 = vmatpush3.bf16.msra.mxu0 %v1868_v5  ;;  %v79_v31 = vld [vmem:[#allocation3 + $0x38] sm:$0xff]  ;;  %v80_v32 = vld [vmem:[#allocation3 + $0x40] sm:$0xff]  ;;  %v81_v33 = vld [vmem:[#allocation3 + $0x48] sm:$0xff] }
  0x3f   :  { %1521 = vmatprep.subr.bf16.mxu0 %v1873_v8  ;;  %v82_v34 = vld [vmem:[#allocation3 + $0x50] sm:$0xff]  ;;  %v83_v35 = vld [vmem:[#allocation3 + $0x58] sm:$0xff]  ;;  %v84_v36 = vld [vmem:[#allocation3 + $0x60] sm:$0xff] }
  0x40   :  { %v85_v37 = vld [vmem:[#allocation3 + $0x68] sm:$0xff]  ;;  %v86_v38 = vld [vmem:[#allocation3 + $0x70] sm:$0xff]  ;;  %v87_v39 = vld [vmem:[#allocation3 + $0x78] sm:$0xff] }
  0x41   :  { %v1915_v40 = vld [vmem:[#allocation6] sm:$0xff]  ;;  %v1966_v1 = vld [vmem:[#allocation6 + $0x8] sm:$0xff]  ;;  %v1968_v2 = vld [vmem:[#allocation6 + $0x10] sm:$0xff] }
  0x42   :  { %1523 = vmatpush3.bf16.msra.mxu0 %v1873_v8  ;;  %1320 = vmatprep.mubr.f32.mxu1 %v1915_v40  ;;  %v1972_v4 = vld [vmem:[#allocation6 + $0x18] sm:$0xff]  ;;  %v1974_v6 = vld [vmem:[#allocation6 + $0x20] sm:$0xff]  ;;  %v1978_v7 = vld [vmem:[#allocation6 + $0x28] sm:$0xff] }
  0x43   :  { %1525 = vmatprep.subr.bf16.mxu0 %v1877_v12  ;;  %v1980_v9 = vld [vmem:[#allocation6 + $0x30] sm:$0xff]  ;;  %v1984_v10 = vld [vmem:[#allocation6 + $0x38] sm:$0xff]  ;;  %v1986_v11 = vld [vmem:[#allocation6 + $0x40] sm:$0xff] }
  0x44   :  { %v1990_v13 = vld [vmem:[#allocation6 + $0x48] sm:$0xff]  ;;  %v1992_v14 = vld [vmem:[#allocation6 + $0x50] sm:$0xff]  ;;  %v1996_v16 = vld [vmem:[#allocation6 + $0x58] sm:$0xff] }
  0x45   :  { %v1998_v17 = vld [vmem:[#allocation6 + $0x60] sm:$0xff]  ;;  %v2002_v19 = vld [vmem:[#allocation6 + $0x68] sm:$0xff]  ;;  %v2004_v20 = vld [vmem:[#allocation6 + $0x70] sm:$0xff] }
  0x46   :  { %1527 = vmatpush3.bf16.msra.mxu0 %v1877_v12  ;;  %v2008_v22 = vld [vmem:[#allocation6 + $0x78] sm:$0xff] }
  0x47   :  { %1529 = vmatprep.subr.bf16.mxu0 %v1881_v15 }
  0x4a   :  { %1531 = vmatpush3.bf16.msra.mxu0 %v1881_v15 }
  0x4b   :  { %1533 = vmatprep.subr.bf16.mxu0 %v1885_v18 }
  0x4e   :  { %1535 = vmatpush3.bf16.msra.mxu0 %v1885_v18 }
  0x4f   :  { %1537 = vmatprep.subr.bf16.mxu0 %v1889_v21 }
  0x52   :  { %1539 = vmatpush3.bf16.msra.mxu0 %v1889_v21 }
  0x53   :  { %1541 = vmatprep.subr.bf16.mxu0 %v1893_v24 }
  0x56   :  { %1543 = vmatpush3.bf16.msra.mxu0 %v1893_v24 }
  0x57   :  { %1577 = vmatprep.subr.bf16.mxu0 %v1866_v3 }
  0x59   :  { %1265 = vmatmul.mubr.f32.vlgmr.msra.gmra.mrb[0].mxu0 %v73_v25 }
  0x5a   :  { %1267 = vmatprep.mubr.f32.mxu0 %v74_v26  ;;  %1579 = vmatpush3.bf16.msra.mxu0 %v1866_v3 }
  0x5b   :  { %1581 = vmatprep.subr.bf16.mxu0 %v1868_v5 }
  0x5d   :  { %1268 = vmatmul.mubr.f32.gmra.mrb[2].mxu0 %v75_v27 }
  0x5e   :  { %1270 = vmatprep.mubr.f32.mxu0 %v76_v28  ;;  %1583 = vmatpush3.bf16.msra.mxu0 %v1868_v5 }
  0x5f   :  { %1585 = vmatprep.subr.bf16.mxu0 %v1873_v8 }
  0x61   :  { %1271 = vmatmul.mubr.f32.gmra.mrb[4].mxu0 %v77_v29 }
  0x62   :  { %1273 = vmatprep.mubr.f32.mxu0 %v78_v30  ;;  %1587 = vmatpush3.bf16.msra.mxu0 %v1873_v8 }
  0x63   :  { %1589 = vmatprep.subr.bf16.mxu0 %v1877_v12 }
  0x65   :  { %1274 = vmatmul.mubr.f32.gmra.mrb[6].mxu0 %v79_v31 }
  0x66   :  { %1276 = vmatprep.mubr.f32.mxu0 %v80_v32  ;;  %1591 = vmatpush3.bf16.msra.mxu0 %v1877_v12 }
  0x67   :  { %1593 = vmatprep.subr.bf16.mxu0 %v1881_v15 }
  0x69   :  { %1277 = vmatmul.mubr.f32.gmra.mrb[8].mxu0 %v81_v33 }
  0x6a   :  { %1279 = vmatprep.mubr.f32.mxu0 %v82_v34  ;;  %1595 = vmatpush3.bf16.msra.mxu0 %v1881_v15 }
  0x6b   :  { %1597 = vmatprep.subr.bf16.mxu0 %v1885_v18 }
  0x6d   :  { %1280 = vmatmul.mubr.f32.gmra.mrb[10].mxu0 %v83_v35 }
  0x6e   :  { %1282 = vmatprep.mubr.f32.mxu0 %v84_v36  ;;  %1599 = vmatpush3.bf16.msra.mxu0 %v1885_v18 }
  0x6f   :  { %1601 = vmatprep.subr.bf16.mxu0 %v1889_v21 }
  0x71   :  { %1283 = vmatmul.mubr.f32.gmra.mrb[12].mxu0 %v85_v37 }
  0x72   :  { %1285 = vmatprep.mubr.f32.mxu0 %v86_v38  ;;  %1603 = vmatpush3.bf16.msra.mxu0 %v1889_v21 }
  0x73   :  { %1605 = vmatprep.subr.bf16.mxu0 %v1893_v24 }
  0x75   :  { %1286 = vmatmul.mubr.f32.gmra.mrb[14].mxu0 %v87_v39 }
  0x76   :  { %1607 = vmatpush3.bf16.msra.mxu0 %v1893_v24 }
  0x77   :  { %1641 = vmatprep.subr.bf16.mxu0 %v1866_v3 }
 0x12c   :  { %v1918_v41 = vpop.f32.mrb[0].mxu0 }
 0x12d   :  { %v1920_v42 = vpop.f32.mrb[1].mxu0 }
 0x12e   :  { %v1544_v43 = vpack.c.bf16 %v1918_v41, %v1920_v42 }
 0x130   :  { %v1924_v44 = vpop.f32.mrb[2].mxu0  ;;  %1545 = vmatprep.subr.bf16.mxu1 %v1544_v43 }
 0x131   :  { %v1926_v45 = vpop.f32.mrb[3].mxu0  ;;  %1547 = vmatpush3.bf16.msra.mxu1 %v1544_v43 }
 0x132   :  { %v1548_v46 = vpack.c.bf16 %v1924_v44, %v1926_v45 }
 0x134   :  { %v1930_v47 = vpop.f32.mrb[4].mxu0  ;;  %1549 = vmatprep.subr.bf16.mxu1 %v1548_v46 }
 0x135   :  { %v1932_v48 = vpop.f32.mrb[5].mxu0  ;;  %1551 = vmatpush3.bf16.msra.mxu1 %v1548_v46 }
 0x136   :  { %v1552_v49 = vpack.c.bf16 %v1930_v47, %v1932_v48 }
 0x138   :  { %v1936_v50 = vpop.f32.mrb[6].mxu0  ;;  %1553 = vmatprep.subr.bf16.mxu1 %v1552_v49 }
 0x139   :  { %v1938_v51 = vpop.f32.mrb[7].mxu0  ;;  %1555 = vmatpush3.bf16.msra.mxu1 %v1552_v49 }
 0x13a   :  { %v1556_v52 = vpack.c.bf16 %v1936_v50, %v1938_v51 }
 0x13c   :  { %v1942_v53 = vpop.f32.mrb[8].mxu0  ;;  %1557 = vmatprep.subr.bf16.mxu1 %v1556_v52 }
 0x13d   :  { %v1944_v54 = vpop.f32.mrb[9].mxu0  ;;  %1559 = vmatpush3.bf16.msra.mxu1 %v1556_v52 }
 0x13e   :  { %v1560_v55 = vpack.c.bf16 %v1942_v53, %v1944_v54 }
 0x140   :  { %v1948_v56 = vpop.f32.mrb[10].mxu0  ;;  %1561 = vmatprep.subr.bf16.mxu1 %v1560_v55 }
 0x141   :  { %v1950_v57 = vpop.f32.mrb[11].mxu0  ;;  %1563 = vmatpush3.bf16.msra.mxu1 %v1560_v55 }
 0x142   :  { %v1564_v58 = vpack.c.bf16 %v1948_v56, %v1950_v57 }
 0x144   :  { %v1954_v59 = vpop.f32.mrb[12].mxu0  ;;  %1565 = vmatprep.subr.bf16.mxu1 %v1564_v58 }
 0x145   :  { %v1956_v60 = vpop.f32.mrb[13].mxu0  ;;  %1567 = vmatpush3.bf16.msra.mxu1 %v1564_v58 }
 0x146   :  { %v1568_v61 = vpack.c.bf16 %v1954_v59, %v1956_v60 }
 0x148   :  { %v1960_v62 = vpop.f32.mrb[14].mxu0  ;;  %1569 = vmatprep.subr.bf16.mxu1 %v1568_v61 }
 0x149   :  { %v1962_v63 = vpop.f32.mrb[15].mxu0  ;;  %1571 = vmatpush3.bf16.msra.mxu1 %v1568_v61 }
 0x14a   :  { %v1572_v0 = vpack.c.bf16 %v1960_v62, %v1962_v63 }
 0x14c   :  { %1573 = vmatprep.subr.bf16.mxu1 %v1572_v0 }
 0x14d   :  { %1575 = vmatpush3.bf16.msra.mxu1 %v1572_v0 }
 0x150   :  { %1321 = vmatmul.mubr.f32.vlgmr.msra.gmra.mrb[0].mxu1 %v1966_v1 }
 0x151   :  { %1323 = vmatprep.mubr.f32.mxu1 %v1968_v2 }
 0x154   :  { %1324 = vmatmul.mubr.f32.gmra.mrb[2].mxu1 %v1972_v4 }
 0x155   :  { %1326 = vmatprep.mubr.f32.mxu1 %v1974_v6 }
 0x158   :  { %1327 = vmatmul.mubr.f32.gmra.mrb[4].mxu1 %v1978_v7 }
 0x159   :  { %1329 = vmatprep.mubr.f32.mxu1 %v1980_v9 }
 0x15c   :  { %1330 = vmatmul.mubr.f32.gmra.mrb[6].mxu1 %v1984_v10 }
 0x15d   :  { %1332 = vmatprep.mubr.f32.mxu1 %v1986_v11 }
 0x160   :  { %1333 = vmatmul.mubr.f32.gmra.mrb[8].mxu1 %v1990_v13 }
 0x161   :  { %1335 = vmatprep.mubr.f32.mxu1 %v1992_v14 }
 0x164   :  { %1336 = vmatmul.mubr.f32.gmra.mrb[10].mxu1 %v1996_v16 }
 0x165   :  { %1338 = vmatprep.mubr.f32.mxu1 %v1998_v17 }
 0x168   :  { %1339 = vmatmul.mubr.f32.gmra.mrb[12].mxu1 %v2002_v19 }
 0x169   :  { %1341 = vmatprep.mubr.f32.mxu1 %v2004_v20 }
 0x16c   :  { %1342 = vmatmul.mubr.f32.gmra.mrb[14].mxu1 %v2008_v22 }
 0x16d   :  { %1432 = vmatprep.mubr.f32.mxu1 %v1915_v40 }
 0x223   :  { %v1322_v23 = vpop.f32.mrb[0].mxu1 }
 0x224   :  { %v460_v25 = vmul.f32 2.0, %v1322_v23  ;;  %v380_v26 = vpop.f32.mrb[1].mxu1 }
 0x225   :  { %v459_v27 = vmul.f32 2.0, %v380_v26 }
 0x226   :  { %v476_v28 = vsub.f32 %v460_v25, %v1918_v41 }
 0x227   :  { %v475_v29 = vsub.f32 %v459_v27, %v1920_v42  ;;  %v1325_v30 = vpop.f32.mrb[2].mxu1 }
 0x228   :  { %v462_v31 = vmul.f32 2.0, %v1325_v30  ;;  %v390_v32 = vpop.f32.mrb[3].mxu1 }
 0x229   :  { %v461_v33 = vmul.f32 2.0, %v390_v32  ;;  %1376 = vmatprep.mubr.f32.mxu0 %v475_v29 }
 0x22a   :  { %v478_v34 = vsub.f32 %v462_v31, %v1924_v44  ;;  %1377 = vmatmul.mubr.f32.vlgmr.msra.gmra.mrb[16].mxu0 %v476_v28 }
 0x22b   :  { %v477_v35 = vsub.f32 %v461_v33, %v1926_v45  ;;  %v1328_v36 = vpop.f32.mrb[4].mxu1  ;;  %1643 = vmatpush3.bf16.msra.mxu0 %v1866_v3 }
 0x22c   :  { %v464_v37 = vmul.f32 2.0, %v1328_v36  ;;  %v400_v38 = vpop.f32.mrb[5].mxu1  ;;  %1645 = vmatprep.subr.bf16.mxu0 %v1868_v5 }
 0x22d   :  { %v463_v39 = vmul.f32 2.0, %v400_v38  ;;  %1379 = vmatprep.mubr.f32.mxu0 %v477_v35 }
 0x22e   :  { %v480_v40 = vsub.f32 %v464_v37, %v1930_v47  ;;  %1380 = vmatmul.mubr.f32.gmra.mrb[18].mxu0 %v478_v34 }
 0x22f   :  { %v479_v43 = vsub.f32 %v463_v39, %v1932_v48  ;;  %v1331_v46 = vpop.f32.mrb[6].mxu1  ;;  %1647 = vmatpush3.bf16.msra.mxu0 %v1868_v5 }
 0x230   :  { %v466_v49 = vmul.f32 2.0, %v1331_v46  ;;  %v410_v52 = vpop.f32.mrb[7].mxu1  ;;  %1649 = vmatprep.subr.bf16.mxu0 %v1873_v8 }
 0x231   :  { %v465_v55 = vmul.f32 2.0, %v410_v52  ;;  %1382 = vmatprep.mubr.f32.mxu0 %v479_v43 }
 0x232   :  { %v482_v58 = vsub.f32 %v466_v49, %v1936_v50  ;;  %1383 = vmatmul.mubr.f32.gmra.mrb[20].mxu0 %v480_v40 }
 0x233   :  { %v481_v61 = vsub.f32 %v465_v55, %v1938_v51  ;;  %v1334_v0 = vpop.f32.mrb[8].mxu1  ;;  %1651 = vmatpush3.bf16.msra.mxu0 %v1873_v8 }
 0x234   :  { %v468_v23 = vmul.f32 2.0, %v1334_v0  ;;  %v420_v25 = vpop.f32.mrb[9].mxu1  ;;  %1653 = vmatprep.subr.bf16.mxu0 %v1877_v12 }
 0x235   :  { %v467_v26 = vmul.f32 2.0, %v420_v25  ;;  %1385 = vmatprep.mubr.f32.mxu0 %v481_v61 }
 0x236   :  { %v484_v27 = vsub.f32 %v468_v23, %v1942_v53  ;;  %1386 = vmatmul.mubr.f32.gmra.mrb[22].mxu0 %v482_v58 }
 0x237   :  { %v483_v28 = vsub.f32 %v467_v26, %v1944_v54  ;;  %v1337_v29 = vpop.f32.mrb[10].mxu1  ;;  %1655 = vmatpush3.bf16.msra.mxu0 %v1877_v12 }
 0x238   :  { %v470_v30 = vmul.f32 2.0, %v1337_v29  ;;  %v430_v31 = vpop.f32.mrb[11].mxu1  ;;  %1657 = vmatprep.subr.bf16.mxu0 %v1881_v15 }
 0x239   :  { %v469_v32 = vmul.f32 2.0, %v430_v31  ;;  %1388 = vmatprep.mubr.f32.mxu0 %v483_v28 }
 0x23a   :  { %v486_v33 = vsub.f32 %v470_v30, %v1948_v56  ;;  %1389 = vmatmul.mubr.f32.gmra.mrb[24].mxu0 %v484_v27 }
 0x23b   :  { %v485_v34 = vsub.f32 %v469_v32, %v1950_v57  ;;  %v1340_v35 = vpop.f32.mrb[12].mxu1  ;;  %1659 = vmatpush3.bf16.msra.mxu0 %v1881_v15 }
 0x23c   :  { %v472_v36 = vmul.f32 2.0, %v1340_v35  ;;  %v440_v37 = vpop.f32.mrb[13].mxu1  ;;  %1661 = vmatprep.subr.bf16.mxu0 %v1885_v18 }
 0x23d   :  { %v471_v38 = vmul.f32 2.0, %v440_v37  ;;  %1391 = vmatprep.mubr.f32.mxu0 %v485_v34 }
 0x23e   :  { %v488_v39 = vsub.f32 %v472_v36, %v1954_v59  ;;  %1392 = vmatmul.mubr.f32.gmra.mrb[26].mxu0 %v486_v33 }
 0x23f   :  { %v487_v40 = vsub.f32 %v471_v38, %v1956_v60  ;;  %v1343_v43 = vpop.f32.mrb[14].mxu1  ;;  %1663 = vmatpush3.bf16.msra.mxu0 %v1885_v18 }
 0x240   :  { %v474_v46 = vmul.f32 2.0, %v1343_v43  ;;  %v450_v49 = vpop.f32.mrb[15].mxu1  ;;  %1665 = vmatprep.subr.bf16.mxu0 %v1889_v21 }
 0x241   :  { %v473_v52 = vmul.f32 2.0, %v450_v49  ;;  %1394 = vmatprep.mubr.f32.mxu0 %v487_v40 }
 0x242   :  { %v490_v55 = vsub.f32 %v474_v46, %v1960_v62  ;;  %1395 = vmatmul.mubr.f32.gmra.mrb[28].mxu0 %v488_v39 }
 0x243   :  { %v489_v58 = vsub.f32 %v473_v52, %v1962_v63  ;;  %1667 = vmatpush3.bf16.msra.mxu0 %v1889_v21 }
 0x244   :  { %1669 = vmatprep.subr.bf16.mxu0 %v1893_v24 }
 0x245   :  { %1397 = vmatprep.mubr.f32.mxu0 %v489_v58 }
 0x246   :  { %1398 = vmatmul.mubr.f32.gmra.mrb[30].mxu0 %v490_v55 }
 0x247   :  { %1671 = vmatpush3.bf16.msra.mxu0 %v1893_v24 }
 0x2fd   :  { %v1378_v61 = vpop.f32.mrb[16].mxu0 }
 0x2fe   :  { %v557_v0 = vpop.f32.mrb[17].mxu0 }
 0x2ff   :  { %v1608_v23 = vpack.c.bf16 %v1378_v61, %v557_v0 }
 0x301   :  { %v1381_v25 = vpop.f32.mrb[18].mxu0  ;;  %1609 = vmatprep.subr.bf16.mxu1 %v1608_v23 }
 0x302   :  { %v567_v26 = vpop.f32.mrb[19].mxu0  ;;  %1611 = vmatpush3.bf16.msra.mxu1 %v1608_v23 }
 0x303   :  { %v1612_v27 = vpack.c.bf16 %v1381_v25, %v567_v26 }
 0x305   :  { %v1384_v28 = vpop.f32.mrb[20].mxu0  ;;  %1613 = vmatprep.subr.bf16.mxu1 %v1612_v27 }
 0x306   :  { %v577_v29 = vpop.f32.mrb[21].mxu0  ;;  %1615 = vmatpush3.bf16.msra.mxu1 %v1612_v27 }
 0x307   :  { %v1616_v30 = vpack.c.bf16 %v1384_v28, %v577_v29 }
 0x309   :  { %v1387_v31 = vpop.f32.mrb[22].mxu0  ;;  %1617 = vmatprep.subr.bf16.mxu1 %v1616_v30 }
 0x30a   :  { %v587_v32 = vpop.f32.mrb[23].mxu0  ;;  %1619 = vmatpush3.bf16.msra.mxu1 %v1616_v30 }
 0x30b   :  { %v1620_v33 = vpack.c.bf16 %v1387_v31, %v587_v32 }
 0x30d   :  { %v1390_v34 = vpop.f32.mrb[24].mxu0  ;;  %1621 = vmatprep.subr.bf16.mxu1 %v1620_v33 }
 0x30e   :  { %v597_v35 = vpop.f32.mrb[25].mxu0  ;;  %1623 = vmatpush3.bf16.msra.mxu1 %v1620_v33 }
 0x30f   :  { %v1624_v36 = vpack.c.bf16 %v1390_v34, %v597_v35 }
 0x311   :  { %v1393_v37 = vpop.f32.mrb[26].mxu0  ;;  %1625 = vmatprep.subr.bf16.mxu1 %v1624_v36 }
 0x312   :  { %v607_v38 = vpop.f32.mrb[27].mxu0  ;;  %1627 = vmatpush3.bf16.msra.mxu1 %v1624_v36 }
 0x313   :  { %v1628_v39 = vpack.c.bf16 %v1393_v37, %v607_v38 }
 0x315   :  { %v1396_v40 = vpop.f32.mrb[28].mxu0  ;;  %1629 = vmatprep.subr.bf16.mxu1 %v1628_v39 }
 0x316   :  { %v617_v43 = vpop.f32.mrb[29].mxu0  ;;  %1631 = vmatpush3.bf16.msra.mxu1 %v1628_v39 }
 0x317   :  { %v1632_v46 = vpack.c.bf16 %v1396_v40, %v617_v43 }
 0x319   :  { %v1399_v49 = vpop.f32.mrb[30].mxu0  ;;  %1633 = vmatprep.subr.bf16.mxu1 %v1632_v46 }
 0x31a   :  { %v627_v52 = vpop.f32.mrb[31].mxu0  ;;  %1635 = vmatpush3.bf16.msra.mxu1 %v1632_v46 }
 0x31b   :  { %v1636_v55 = vpack.c.bf16 %v1399_v49, %v627_v52 }
 0x31d   :  { %1637 = vmatprep.subr.bf16.mxu1 %v1636_v55 }
 0x31e   :  { %1639 = vmatpush3.bf16.msra.mxu1 %v1636_v55 }
 0x31f   :  { %1672 = vmatprep.subr.bf16.mxu1 %v1866_v3 }
 0x321   :  { %1433 = vmatmul.mubr.f32.vlgmr.msra.gmra.mrb[16].mxu1 %v1966_v1 }
 0x322   :  { %1435 = vmatprep.mubr.f32.mxu1 %v1968_v2  ;;  %1680 = vmatpush3.bf16.msra.mxu1 %v1866_v3 }
 0x323   :  { %1673 = vmatprep.subr.bf16.mxu1 %v1868_v5 }
 0x325   :  { %1436 = vmatmul.mubr.f32.gmra.mrb[18].mxu1 %v1972_v4 }
 0x326   :  { %1438 = vmatprep.mubr.f32.mxu1 %v1974_v6  ;;  %1681 = vmatpush3.bf16.msra.mxu1 %v1868_v5 }
 0x327   :  { %1674 = vmatprep.subr.bf16.mxu1 %v1873_v8 }
 0x329   :  { %1439 = vmatmul.mubr.f32.gmra.mrb[20].mxu1 %v1978_v7 }
 0x32a   :  { %1441 = vmatprep.mubr.f32.mxu1 %v1980_v9  ;;  %1682 = vmatpush3.bf16.msra.mxu1 %v1873_v8 }
 0x32b   :  { %1675 = vmatprep.subr.bf16.mxu1 %v1877_v12 }
 0x32d   :  { %1442 = vmatmul.mubr.f32.gmra.mrb[22].mxu1 %v1984_v10 }
 0x32e   :  { %1444 = vmatprep.mubr.f32.mxu1 %v1986_v11  ;;  %1683 = vmatpush3.bf16.msra.mxu1 %v1877_v12 }
 0x32f   :  { %1676 = vmatprep.subr.bf16.mxu1 %v1881_v15 }
 0x331   :  { %1445 = vmatmul.mubr.f32.gmra.mrb[24].mxu1 %v1990_v13 }
 0x332   :  { %1447 = vmatprep.mubr.f32.mxu1 %v1992_v14  ;;  %1684 = vmatpush3.bf16.msra.mxu1 %v1881_v15 }
 0x333   :  { %1677 = vmatprep.subr.bf16.mxu1 %v1885_v18 }
 0x335   :  { %1448 = vmatmul.mubr.f32.gmra.mrb[26].mxu1 %v1996_v16 }
 0x336   :  { %1450 = vmatprep.mubr.f32.mxu1 %v1998_v17  ;;  %1685 = vmatpush3.bf16.msra.mxu1 %v1885_v18 }
 0x337   :  { %1678 = vmatprep.subr.bf16.mxu1 %v1889_v21 }
 0x339   :  { %1451 = vmatmul.mubr.f32.gmra.mrb[28].mxu1 %v2002_v19 }
 0x33a   :  { %1453 = vmatprep.mubr.f32.mxu1 %v2004_v20  ;;  %1686 = vmatpush3.bf16.msra.mxu1 %v1889_v21 }
 0x33b   :  { %1679 = vmatprep.subr.bf16.mxu1 %v1893_v24 }
 0x33d   :  { %1454 = vmatmul.mubr.f32.gmra.mrb[30].mxu1 %v2008_v22 }
 0x33e   :  { %1687 = vmatpush3.bf16.msra.mxu1 %v1893_v24 }
 0x3f4   :  { %v1434_v3 = vpop.f32.mrb[16].mxu1 }
 0x3f5   :  { %v830_v5 = vmul.f32 2.0, %v1434_v3  ;;  %v750_v8 = vpop.f32.mrb[17].mxu1 }
 0x3f6   :  { %v829_v12 = vmul.f32 2.0, %v750_v8 }
 0x3f7   :  { %v846_v15 = vsub.f32 %v830_v5, %v1918_v41 }
 0x3f8   :  { %v845_v18 = vsub.f32 %v829_v12, %v1920_v42  ;;  %v1437_v1 = vpop.f32.mrb[18].mxu1 }
 0x3f9   :  { %v832_v2 = vmul.f32 2.0, %v1437_v1  ;;  %v760_v4 = vpop.f32.mrb[19].mxu1 }
 0x3fa   :  { %v831_v6 = vmul.f32 2.0, %v760_v4  ;;  %1488 = vmatprep.mubr.f32.mxu0 %v845_v18 }
 0x3fb   :  { %v848_v21 = vsub.f32 %v832_v2, %v1924_v44  ;;  %1489 = vmatmul.mubr.f32.vlgmr.msra.gmra.mrb[32].mxu0 %v846_v15 }
 0x3fc   :  { %v847_v7 = vsub.f32 %v831_v6, %v1926_v45  ;;  %v1440_v9 = vpop.f32.mrb[20].mxu1 }
 0x3fd   :  { %v834_v24 = vmul.f32 2.0, %v1440_v9  ;;  %v770_v10 = vpop.f32.mrb[21].mxu1 }
 0x3fe   :  { %v833_v11 = vmul.f32 2.0, %v770_v10  ;;  %1491 = vmatprep.mubr.f32.mxu0 %v847_v7 }
 0x3ff   :  { %v850_v13 = vsub.f32 %v834_v24, %v1930_v47  ;;  %1492 = vmatmul.mubr.f32.gmra.mrb[34].mxu0 %v848_v21 }
 0x400   :  { %v849_v41 = vsub.f32 %v833_v11, %v1932_v48  ;;  %v1443_v42 = vpop.f32.mrb[22].mxu1 }
 0x401   :  { %v836_v14 = vmul.f32 2.0, %v1443_v42  ;;  %v780_v16 = vpop.f32.mrb[23].mxu1 }
 0x402   :  { %v835_v17 = vmul.f32 2.0, %v780_v16  ;;  %1494 = vmatprep.mubr.f32.mxu0 %v849_v41 }
 0x403   :  { %v852_v44 = vsub.f32 %v836_v14, %v1936_v50  ;;  %1495 = vmatmul.mubr.f32.gmra.mrb[36].mxu0 %v850_v13 }
 0x404   :  { %v851_v45 = vsub.f32 %v835_v17, %v1938_v51  ;;  %v1446_v19 = vpop.f32.mrb[24].mxu1 }
 0x405   :  { %v838_v20 = vmul.f32 2.0, %v1446_v19  ;;  %v790_v22 = vpop.f32.mrb[25].mxu1 }
 0x406   :  { %v837_v58 = vmul.f32 2.0, %v790_v22  ;;  %1497 = vmatprep.mubr.f32.mxu0 %v851_v45 }
 0x407   :  { %v854_v47 = vsub.f32 %v838_v20, %v1942_v53  ;;  %1498 = vmatmul.mubr.f32.gmra.mrb[38].mxu0 %v852_v44 }
 0x408   :  { %v853_v48 = vsub.f32 %v837_v58, %v1944_v54  ;;  %v1449_v61 = vpop.f32.mrb[26].mxu1 }
 0x409   :  { %v840_v0 = vmul.f32 2.0, %v1449_v61  ;;  %v800_v23 = vpop.f32.mrb[27].mxu1 }
 0x40a   :  { %v839_v25 = vmul.f32 2.0, %v800_v23  ;;  %1500 = vmatprep.mubr.f32.mxu1 %v853_v48 }
 0x40b   :  { %v856_v50 = vsub.f32 %v840_v0, %v1948_v56  ;;  %1501 = vmatmul.mubr.f32.vlgmr.msra.gmra.mrb[32].mxu1 %v854_v47 }
 0x40c   :  { %v855_v51 = vsub.f32 %v839_v25, %v1950_v57  ;;  %v1452_v26 = vpop.f32.mrb[28].mxu1 }
 0x40d   :  { %v842_v27 = vmul.f32 2.0, %v1452_v26  ;;  %v810_v28 = vpop.f32.mrb[29].mxu1 }
 0x40e   :  { %v841_v29 = vmul.f32 2.0, %v810_v28  ;;  %1503 = vmatprep.mubr.f32.mxu1 %v855_v51 }
 0x40f   :  { %v858_v53 = vsub.f32 %v842_v27, %v1954_v59  ;;  %1504 = vmatmul.mubr.f32.gmra.mrb[34].mxu1 %v856_v50 }
 0x410   :  { %v857_v54 = vsub.f32 %v841_v29, %v1956_v60  ;;  %v1455_v30 = vpop.f32.mrb[30].mxu1 }
 0x411   :  { %v844_v31 = vmul.f32 2.0, %v1455_v30  ;;  %v820_v32 = vpop.f32.mrb[31].mxu1 }
 0x412   :  { %v843_v33 = vmul.f32 2.0, %v820_v32  ;;  %1506 = vmatprep.mubr.f32.mxu1 %v857_v54 }
 0x413   :  { %v860_v56 = vsub.f32 %v844_v31, %v1960_v62  ;;  %1507 = vmatmul.mubr.f32.gmra.mrb[36].mxu1 %v858_v53 }
 0x414   :  { %v859_v57 = vsub.f32 %v843_v33, %v1962_v63 }
 0x416   :  { %1509 = vmatprep.mubr.f32.mxu1 %v859_v57 }
 0x417   :  { %1510 = vmatmul.mubr.f32.gmra.mrb[38].mxu1 %v860_v56 }
 0x4ce   :  { %v1490_v34 = vpop.f32.mrb[32].mxu0 }
 0x4cf   :  { %1039 = vst [vmem:[#allocation9 + $0x8] sm:$0xff] %v1490_v34  ;;  %v927_v35 = vpop.f32.mrb[33].mxu0 }
 0x4d0   :  { %1038 = vst [vmem:[#allocation9] sm:$0xff] %v927_v35 }
 0x4d2   :  { %v1493_v59 = vpop.f32.mrb[34].mxu0 }
 0x4d3   :  { %1041 = vst [vmem:[#allocation9 + $0x18] sm:$0xff] %v1493_v59  ;;  %v937_v36 = vpop.f32.mrb[35].mxu0 }
 0x4d4   :  { %1040 = vst [vmem:[#allocation9 + $0x10] sm:$0xff] %v937_v36 }
 0x4d6   :  { %v1496_v60 = vpop.f32.mrb[36].mxu0 }
 0x4d7   :  { %1043 = vst [vmem:[#allocation9 + $0x28] sm:$0xff] %v1496_v60  ;;  %v947_v37 = vpop.f32.mrb[37].mxu0 }
 0x4d8   :  { %1042 = vst [vmem:[#allocation9 + $0x20] sm:$0xff] %v947_v37 }
 0x4da   :  { %v1499_v38 = vpop.f32.mrb[38].mxu0 }
 0x4db   :  { %1045 = vst [vmem:[#allocation9 + $0x38] sm:$0xff] %v1499_v38  ;;  %v957_v62 = vpop.f32.mrb[39].mxu0 }
 0x4dc   :  { %1044 = vst [vmem:[#allocation9 + $0x30] sm:$0xff] %v957_v62 }
 0x4de   :  { %v1502_v39 = vpop.f32.mrb[32].mxu1 }
 0x4df   :  { %1047 = vst [vmem:[#allocation9 + $0x48] sm:$0xff] %v1502_v39  ;;  %v967_v63 = vpop.f32.mrb[33].mxu1 }
 0x4e0   :  { %1046 = vst [vmem:[#allocation9 + $0x40] sm:$0xff] %v967_v63 }
 0x4e2   :  { %v1505_v40 = vpop.f32.mrb[34].mxu1 }
 0x4e3   :  { %1049 = vst [vmem:[#allocation9 + $0x58] sm:$0xff] %v1505_v40  ;;  %v977_v43 = vpop.f32.mrb[35].mxu1 }
 0x4e4   :  { %1048 = vst [vmem:[#allocation9 + $0x50] sm:$0xff] %v977_v43 }
 0x4e6   :  { %v1508_v46 = vpop.f32.mrb[36].mxu1 }
 0x4e7   :  { %1051 = vst [vmem:[#allocation9 + $0x68] sm:$0xff] %v1508_v46  ;;  %v987_v49 = vpop.f32.mrb[37].mxu1 }
 0x4e8   :  { %1050 = vst [vmem:[#allocation9 + $0x60] sm:$0xff] %v987_v49 }
 0x4ea   :  { %v1511_v52 = vpop.f32.mrb[38].mxu1 }
 0x4eb   :  { %1053 = vst [vmem:[#allocation9 + $0x78] sm:$0xff] %v1511_v52  ;;  %v997_v55 = vpop.f32.mrb[39].mxu1 }
 0x4ec   :  { %1052 = vst [vmem:[#allocation9 + $0x70] sm:$0xff] %v997_v55 }
 0x4ed   :  { %1771 = shalt.err (!%p1768_p0)
}
 0x4ee   :  { %s1772_s27 = scalar_lea.hbm %s2108_s3, 2048 }
 0x4ef   :  { %p1773_p1 = scmp.ne.s32.totalorder %s2108_s3, %s1772_s27  ;;  %p1776_p2 = scmp.lt.u32.totalorder %s1772_s27, %s2108_s3 }
 0x4f1   :  { %p1778_p3 = pnand %p1776_p2, %p1773_p1 }
 0x4f3   :  { %1781 = shalt.err (!%p1778_p3)
}
 0x4f4   :  { %1065 = dma.vmem_to_hbm [thread:$0]  %s1060_s21, 2048, %s2108_s3, [#allocation5], %s1790_s24, %s1790_s24, %s1791_s25  }
 0x4f5   :  { %1786 = dma.done.wait [#allocation5], 2048  }
 0x4f6   :  { %1787 = vsyncadd [#allocation5], 4294965248 }
 0x4f7   :  { %1069 = vsyncpa [#allocation4], 1 }
 0x4f8   :  { %1070 = vsyncpa [#allocation7], 1 }
 0x4f9   :  { %1071 = vsyncpa [#allocation5], 1 }

</bundles_post_ra>
